<compile_context>
chip_gen: v5e
topology: v5e:2x2
jax: 0.10.0
libtpu: 0.0.40
codegen_flags: <defaults>
</compile_context>

<pallas_src>
import jax
import jax.numpy as jnp
import numpy as np
from jax.experimental import pallas as pl
from jax.experimental.pallas import tpu as pltpu


def _make_kernel(B_true, N, TB, inv_BN):
    # All closed-over values are Python ints/floats -> fold to jaxpr literals (no captured consts).

    def kernel(pred_ref, label_ref, out_ref, acc_ref):
        step = pl.program_id(0)

        @pl.when(step == 0)
        def _init():
            acc_ref[...] = jnp.zeros_like(acc_ref)

        pred = pred_ref[...].astype(jnp.float32)    # (TB, N)
        label = label_ref[...].astype(jnp.float32)  # (TB, N), assumed binary 0/1

        zero_mask = (label == 0.0).astype(jnp.float32)   # 1 where label == 0
        one_mask = 1.0 - zero_mask                       # 1 where label  > 0

        # ---- MSE partial (pre-scaled so plain accumulation gives the mean) ----
        diff = pred - label
        mse_row = jnp.sum(diff * diff, axis=1, keepdims=True) * inv_BN

        # ---- Correlation term, per row ----
        n_one = jnp.sum(one_mask, axis=1, keepdims=True)   # matches int(sum(label)) for 0/1 labels
        n_zero = float(N) - n_one

        # stabilizing shift: row max of pred (any shift works, product form is shift-invariant)
        m = jnp.max(pred, axis=1, keepdims=True)

        # 2 exps per element; masked positions feed exp(0)=1 then multiply by 0 -> no inf*0 NaNs
        e_zero = jnp.exp((pred - m) * zero_mask) * zero_mask   # exp(pred[l]-m) on zero slots
        e_one = jnp.exp((m - pred) * one_mask) * one_mask      # exp(m-pred[k]) on one  slots
        s_zero = jnp.sum(e_zero, axis=1, keepdims=True)
        s_one = jnp.sum(e_one, axis=1, keepdims=True)

        is_all_zero = (n_one == 0.0).astype(jnp.float32)
        is_all_one = (n_zero == 0.0).astype(jnp.float32)
        is_general = 1.0 - is_all_zero - is_all_one

        safe_one = n_one + is_all_zero      # >= 1 always
        safe_zero = n_zero + is_all_one     # >= 1 always

        loss_all_zero = jnp.exp(m - 1.0) * s_zero / safe_zero        # sum exp(pred-1)   / n_zero
        loss_all_one = jnp.exp(-m) * s_one / safe_one                # sum exp(-pred)    / n_one
        loss_general = s_one * s_zero / (safe_one * safe_zero)       # pairwise exp sum  / (n1*n0)

        loss_row = (is_all_zero * loss_all_zero
                    + is_all_one * loss_all_one
                    + is_general * loss_general)

        # mask out rows added by batch padding
        rid = jax.lax.broadcasted_iota(jnp.int32, (TB, 1), 0) + step * TB
        valid = (rid < B_true).astype(jnp.float32)

        acc_ref[...] += valid * (loss_row + mse_row)

        @pl.when(step == pl.num_programs(0) - 1)
        def _finalize():
            # single cross-sublane reduce, done once
            out_ref[...] = jnp.sum(acc_ref[...], axis=0, keepdims=True)

    return kernel


def correlation_mse_loss(pred, label, *, tile_rows=None):
    """MSE(pred, label) + CorrelationLoss(pred, label) for 2-D [B, N] inputs."""
    assert pred.ndim == 2 and pred.shape == label.shape
    B, N = pred.shape

    # ---- pick a row tile: ~4 MiB per input block => 2 inputs x 2 buffers ~ 16 MiB VMEM,
    #      comfortably inside v7x's 64 MiB (and v5e/v6e's 128 MiB). ----
    if tile_rows is None:
        tile_rows = max(8, min(1024, (4 * 1024 * 1024) // max(1, N * 4)))
    TB = int(tile_rows)
    if TB >= B:
        TB = B                      # single block covering the (small) batch
        B_pad = B
    else:
        TB = max(8, (TB // 8) * 8)  # sublane alignment for partial blocks
        B_pad = ((B + TB - 1) // TB) * TB

    if B_pad != B:                  # zero-pad rows; kernel masks them out
        pad = B_pad - B
        pred = jnp.pad(pred, ((0, pad), (0, 0)))
        label = jnp.pad(label, ((0, pad), (0, 0)))

    grid = (B_pad // TB,)
    inv_BN = 1.0 / float(B * N)
    kernel = _make_kernel(B, N, TB, inv_BN)

    in_bytes = B * N * (pred.dtype.itemsize + label.dtype.itemsize)
    cost = pl.CostEstimate(
        flops=int(14 * B * N),
        transcendentals=int(2 * B * N),
        bytes_accessed=int(in_bytes + 4),
    )

    # explicit VMEM budget: double-buffered inputs + scratch + headroom
    buf_bytes = 2 * TB * N * (pred.dtype.itemsize + label.dtype.itemsize)
    vmem_limit = int(min(64 * 1024 * 1024, max(32 * 1024 * 1024, buf_bytes + (8 << 20))))

    out = pl.pallas_call(
        kernel,
        out_shape=jax.ShapeDtypeStruct((1, 1), jnp.float32),
        grid=grid,
        in_specs=[
            pl.BlockSpec((TB, N), lambda i: (i, 0)),
            pl.BlockSpec((TB, N), lambda i: (i, 0)),
        ],
        out_specs=pl.BlockSpec((1, 1), lambda i: (0, 0)),
        scratch_shapes=[pltpu.VMEM((TB, 1), jnp.float32)],
        compiler_params=pltpu.CompilerParams(
            dimension_semantics=("arbitrary",),   # accumulation axis
            vmem_limit_bytes=vmem_limit,
        ),
        cost_estimate=cost,
    )(pred, label)
    return out[0, 0]


def _reference_numpy(pred, label):
    """Literal re-implementation of the PyTorch forward (loops) for validation."""
    pred = np.asarray(pred, dtype=np.float64)
    label = np.asarray(label, dtype=np.float64)
    mse = np.mean((pred - label) ** 2)
    loss_total = 0.0
    B, N = label.shape
    for i in range(B):
        n_one = int(np.sum(label[i]))
        n_zero = N - n_one
        zero_idx = np.nonzero(label[i] == 0)[0]
        nonzero_idx = np.nonzero(label[i] > 0)[0]
        loss = 0.0
        if n_one == 0:
            for l in zero_idx:
                loss += np.exp(pred[i][l] - 1.0)
            loss /= n_zero
        elif n_zero == 0:
            for k in nonzero_idx:
                loss += np.exp(-pred[i][k])
            loss /= n_one
        else:
            for k in nonzero_idx:
                for l in zero_idx:
                    loss += np.exp(-(pred[i][k] - pred[i][l]))
            loss /= n_one * n_zero
        loss_total += loss
    return mse + loss_total


if __name__ == "__main__":
    key = jax.random.PRNGKey(0)
    B, N = 20, 16

    k_pred, k_lab = jax.random.split(key)
    pred = jax.random.normal(k_pred, (B, N), dtype=jnp.float32)

    # binary labels; include all-zero and all-one rows to hit every branch
    label = (jax.random.uniform(k_lab, (B, N)) > 0.5).astype(jnp.float32)
    label = label.at[1, :].set(0.0)   # all-zero row
    label = label.at[2, :].set(1.0)   # all-one row

    ref = _reference_numpy(np.array(pred), np.array(label))

    # path 1: tiled grid (3 steps, padded batch + row masking)
    out_tiled = jax.block_until_ready(correlation_mse_loss(pred, label, tile_rows=8))
    assert np.allclose(float(out_tiled), ref, rtol=1e-4, atol=1e-4), (float(out_tiled), ref)

    # path 2: default tile sizing (single block)
    out_single = jax.block_until_ready(correlation_mse_loss(pred, label))
    assert np.allclose(float(out_single), ref, rtol=1e-4, atol=1e-4), (float(out_single), ref)

    print("KERNEL_OK")
</pallas_src>

<mosaic_0001>
module attributes {stable_mosaic.version = 11 : i64} {
  func.func @kernel(%arg0: i32, %arg1: memref<8x16xf32, #tpu.memory_space<vmem>>, %arg2: memref<8x16xf32, #tpu.memory_space<vmem>>, %arg3: memref<1x1xf32, #tpu.memory_space<vmem>>, %arg4: memref<8x1xf32, #tpu.memory_space<vmem>>) attributes {dimension_semantics = [#tpu.dimension_semantics<arbitrary>], iteration_bounds = array<i64: 3>, scalar_prefetch = 0 : i64, scratch_operands = 1 : i64, tpu.core_type = #tpu.core_type<tc>, window_params = [{transform_indices = @transform_0, window_bounds = array<i64: 8, 16>}, {transform_indices = @transform_1, window_bounds = array<i64: 8, 16>}, {pipeline_mode = #tpu.pipeline_mode<synchronous>, transform_indices = @transform_2, window_bounds = array<i64: 1, 1>}]} {
    %c0_i32 = arith.constant 0 : i32
    %0 = arith.cmpi eq, %arg0, %c0_i32 : i32
    %1 = arith.extui %0 : i1 to i32
    %c0_i32_0 = arith.constant 0 : i32
    %2 = arith.cmpi ne, %1, %c0_i32_0 : i32
    scf.if %2 {
      %cst_22 = arith.constant 0.000000e+00 : f32
      %84 = vector.broadcast %cst_22 : f32 to vector<8x1xf32>
      %c0_23 = arith.constant 0 : index
      %c0_24 = arith.constant 0 : index
      %85 = vector.load %arg4[%c0_23, %c0_24] : memref<8x1xf32, #tpu.memory_space<vmem>>, vector<8x1xf32>
      tpu.vector_store %arg4[%c0_23, %c0_24], %84 {strides = array<i32>} : memref<8x1xf32, #tpu.memory_space<vmem>>, vector<8x1xf32>,
    } else {
    }
    %c0 = arith.constant 0 : index
    %c0_1 = arith.constant 0 : index
    %3 = vector.load %arg1[%c0, %c0_1] : memref<8x16xf32, #tpu.memory_space<vmem>>, vector<8x16xf32>
    %c0_2 = arith.constant 0 : index
    %c0_3 = arith.constant 0 : index
    %4 = vector.load %arg2[%c0_2, %c0_3] : memref<8x16xf32, #tpu.memory_space<vmem>>, vector<8x16xf32>
    %cst = arith.constant 0.000000e+00 : f32
    %5 = vector.broadcast %cst : f32 to vector<8x16xf32>
    %6 = arith.cmpf oeq, %4, %5 : vector<8x16xf32>
    %7 = arith.extui %6 : vector<8x16xi1> to vector<8x16xi32>
    %8 = arith.sitofp %7 : vector<8x16xi32> to vector<8x16xf32>
    %cst_4 = arith.constant 1.000000e+00 : f32
    %9 = vector.broadcast %cst_4 : f32 to vector<8x16xf32>
    %10 = arith.subf %9, %8 : vector<8x16xf32>
    %11 = arith.subf %3, %4 : vector<8x16xf32>
    %12 = arith.mulf %11, %11 : vector<8x16xf32>
    %cst_5 = arith.constant dense<0.000000e+00> : vector<8xf32>
    %13 = vector.multi_reduction <add>, %12, %cst_5 [1] : vector<8x16xf32> to vector<8xf32>
    %14 = vector.shape_cast %13 : vector<8xf32> to vector<8x1xf32>
    %cst_6 = arith.constant 3.125000e-03 : f32
    %15 = vector.broadcast %cst_6 : f32 to vector<8x1xf32>
    %16 = arith.mulf %14, %15 : vector<8x1xf32>
    %cst_7 = arith.constant dense<0.000000e+00> : vector<8xf32>
    %17 = vector.multi_reduction <add>, %10, %cst_7 [1] : vector<8x16xf32> to vector<8xf32>
    %18 = vector.shape_cast %17 : vector<8xf32> to vector<8x1xf32>
    %cst_8 = arith.constant 1.600000e+01 : f32
    %19 = vector.broadcast %cst_8 : f32 to vector<8x1xf32>
    %20 = arith.subf %19, %18 : vector<8x1xf32>
    %cst_9 = arith.constant dense<0xFF800000> : vector<8xf32>
    %21 = vector.multi_reduction <maximumf>, %3, %cst_9 [1] : vector<8x16xf32> to vector<8xf32>
    %22 = vector.shape_cast %21 : vector<8xf32> to vector<8x1xf32>
    %23 = vector.broadcast %22 : vector<8x1xf32> to vector<8x16xf32>
    %24 = arith.subf %3, %23 : vector<8x16xf32>
    %25 = arith.mulf %24, %8 : vector<8x16xf32>
    %26 = math.exp %25 : vector<8x16xf32>
    %27 = arith.mulf %26, %8 : vector<8x16xf32>
    %28 = vector.broadcast %22 : vector<8x1xf32> to vector<8x16xf32>
    %29 = arith.subf %28, %3 : vector<8x16xf32>
    %30 = arith.mulf %29, %10 : vector<8x16xf32>
    %31 = math.exp %30 : vector<8x16xf32>
    %32 = arith.mulf %31, %10 : vector<8x16xf32>
    %cst_10 = arith.constant dense<0.000000e+00> : vector<8xf32>
    %33 = vector.multi_reduction <add>, %27, %cst_10 [1] : vector<8x16xf32> to vector<8xf32>
    %34 = vector.shape_cast %33 : vector<8xf32> to vector<8x1xf32>
    %cst_11 = arith.constant dense<0.000000e+00> : vector<8xf32>
    %35 = vector.multi_reduction <add>, %32, %cst_11 [1] : vector<8x16xf32> to vector<8xf32>
    %36 = vector.shape_cast %35 : vector<8xf32> to vector<8x1xf32>
    %cst_12 = arith.constant 0.000000e+00 : f32
    %37 = vector.broadcast %cst_12 : f32 to vector<8x1xf32>
    %38 = arith.cmpf oeq, %18, %37 : vector<8x1xf32>
    %39 = arith.extui %38 : vector<8x1xi1> to vector<8x1xi32>
    %40 = arith.sitofp %39 : vector<8x1xi32> to vector<8x1xf32>
    %cst_13 = arith.constant 0.000000e+00 : f32
    %41 = vector.broadcast %cst_13 : f32 to vector<8x1xf32>
    %42 = arith.cmpf oeq, %20, %41 : vector<8x1xf32>
    %43 = arith.extui %42 : vector<8x1xi1> to vector<8x1xi32>
    %44 = arith.sitofp %43 : vector<8x1xi32> to vector<8x1xf32>
    %cst_14 = arith.constant 1.000000e+00 : f32
    %45 = vector.broadcast %cst_14 : f32 to vector<8x1xf32>
    %46 = arith.subf %45, %40 : vector<8x1xf32>
    %47 = arith.subf %46, %44 : vector<8x1xf32>
    %48 = arith.addf %18, %40 : vector<8x1xf32>
    %49 = arith.addf %20, %44 : vector<8x1xf32>
    %cst_15 = arith.constant 1.000000e+00 : f32
    %50 = vector.broadcast %cst_15 : f32 to vector<8x1xf32>
    %51 = arith.subf %22, %50 : vector<8x1xf32>
    %52 = math.exp %51 : vector<8x1xf32>
    %53 = arith.mulf %52, %34 : vector<8x1xf32>
    %54 = arith.divf %53, %49 : vector<8x1xf32>
    %cst_16 = arith.constant 0.000000e+00 : f32
    %55 = vector.broadcast %cst_16 : f32 to vector<8x1xf32>
    %56 = arith.subf %55, %22 : vector<8x1xf32>
    %57 = math.exp %56 : vector<8x1xf32>
    %58 = arith.mulf %57, %36 : vector<8x1xf32>
    %59 = arith.divf %58, %48 : vector<8x1xf32>
    %60 = arith.mulf %36, %34 : vector<8x1xf32>
    %61 = arith.mulf %48, %49 : vector<8x1xf32>
    %62 = arith.divf %60, %61 : vector<8x1xf32>
    %63 = arith.mulf %40, %54 : vector<8x1xf32>
    %64 = arith.mulf %44, %59 : vector<8x1xf32>
    %65 = arith.addf %63, %64 : vector<8x1xf32>
    %66 = arith.mulf %47, %62 : vector<8x1xf32>
    %67 = arith.addf %65, %66 : vector<8x1xf32>
    %68 = tpu.iota {dimensions = array<i32: 0>} : vector<8x1xi32>
    %c8_i32 = arith.constant 8 : i32
    %69 = arith.muli %arg0, %c8_i32 : i32
    %70 = vector.broadcast %69 : i32 to vector<8x1xi32>
    %71 = arith.addi %68, %70 : vector<8x1xi32>
    %c20_i32 = arith.constant 20 : i32
    %72 = vector.broadcast %c20_i32 : i32 to vector<8x1xi32>
    %73 = arith.cmpi slt, %71, %72 : vector<8x1xi32>
    %74 = arith.extui %73 : vector<8x1xi1> to vector<8x1xi32>
    %75 = arith.sitofp %74 : vector<8x1xi32> to vector<8x1xf32>
    %c0_17 = arith.constant 0 : index
    %c0_18 = arith.constant 0 : index
    %76 = vector.load %arg4[%c0_17, %c0_18] : memref<8x1xf32, #tpu.memory_space<vmem>>, vector<8x1xf32>
    %77 = arith.addf %67, %16 : vector<8x1xf32>
    %78 = arith.mulf %75, %77 : vector<8x1xf32>
    %79 = arith.addf %76, %78 : vector<8x1xf32>
    %c0_19 = arith.constant 0 : index
    %c0_20 = arith.constant 0 : index
    %80 = vector.load %arg4[%c0_19, %c0_20] : memref<8x1xf32, #tpu.memory_space<vmem>>, vector<8x1xf32>
    tpu.vector_store %arg4[%c0_19, %c0_20], %79 {strides = array<i32>} : memref<8x1xf32, #tpu.memory_space<vmem>>, vector<8x1xf32>,
    %c2_i32 = arith.constant 2 : i32
    %81 = arith.cmpi eq, %arg0, %c2_i32 : i32
    %82 = arith.extui %81 : i1 to i32
    %c0_i32_21 = arith.constant 0 : i32
    %83 = arith.cmpi ne, %82, %c0_i32_21 : i32
    scf.if %83 {
      %c0_22 = arith.constant 0 : index
      %c0_23 = arith.constant 0 : index
      %84 = vector.load %arg4[%c0_22, %c0_23] : memref<8x1xf32, #tpu.memory_space<vmem>>, vector<8x1xf32>
      %cst_24 = arith.constant dense<0.000000e+00> : vector<1xf32>
      %85 = vector.multi_reduction <add>, %84, %cst_24 [0] : vector<8x1xf32> to vector<1xf32>
      %86 = vector.shape_cast %85 : vector<1xf32> to vector<1x1xf32>
      %c0_25 = arith.constant 0 : index
      %c0_26 = arith.constant 0 : index
      %87 = vector.load %arg3[%c0_25, %c0_26] : memref<1x1xf32, #tpu.memory_space<vmem>>, vector<1x1xf32>
      tpu.vector_store %arg3[%c0_25, %c0_26], %86 {strides = array<i32>} : memref<1x1xf32, #tpu.memory_space<vmem>>, vector<1x1xf32>,
    } else {
    }
    return
  }
  func.func @transform_0(%arg0: i32) -> (i32, i32) {
    %c0_i32 = arith.constant 0 : i32
    %c0_i32_0 = arith.constant 0 : i32
    return %arg0, %c0_i32 : i32, i32
  }
  func.func @transform_1(%arg0: i32) -> (i32, i32) {
    %c0_i32 = arith.constant 0 : i32
    %c0_i32_0 = arith.constant 0 : i32
    return %arg0, %c0_i32 : i32, i32
  }
  func.func @transform_2(%arg0: i32) -> (i32, i32) {
    %c0_i32 = arith.constant 0 : i32
    %c0_i32_0 = arith.constant 0 : i32
    %c0_i32_1 = arith.constant 0 : i32
    return %c0_i32, %c0_i32_0 : i32, i32
  }
}

</mosaic_0001>

<bundles_post_ra>
// kernel: tpu_custom_call.1
= control target key start
LH: loop header
LB: loop body
LE: loop exit
PB: predicated region body
PF: predicated region fallthrough
CT: control target
= control target key end

     0   :  { %7 = vsyncpa [#allocation4], 0  ;;  %s451_s9 = smov 0   ;;  %s516_s0 = inlined_call_operand.vmem [shape: f32[24,16], index: 0, kind: input, shape index: {}]   ;;  %s517_s1 = inlined_call_operand.vmem [shape: f32[24,16], index: 1, kind: input, shape index: {}]   ;;  %s518_s2 = inlined_call_operand.hbm [shape: f32[1,1], index: 2, kind: output, shape index: {}]  }
   0x1 LB: > { %s457_s10 = sadd.s32 4294967295, %s431_s9   ;;  %p347_p0 = scmp.ge.s32.totalorder %s431_s9, 1  ;;  %s431_s9 = sphi %s451_s9, %s13_s9  }
   0x2   : > { %p116_p1 = scmp.lt.s32.totalorder %s431_s9, 4 }
   0x4   : > { %p117_p2 = pnand %p347_p0, %p116_p1 }
   0x5   : > { %p136_p3 = scmp.lt.s32.totalorder (!%p117_p2), %s457_s10, 2  ;;  %p350_p4 = scmp.ne.s32.totalorder (!%p117_p2), %s457_s10, 0 }
   0x6   : > { %120 = sbr.rel (%p117_p2) target bundleno = 320 (0x140), region = 28 }
   0xb   : > { %s137_s11 = scalar_select %p136_p3, %s457_s10, 2 }
   0xc   : > { %147 = sbr.rel (%p350_p4) target bundleno = 19 (0x13), region = 32 }
   0xd   : > { %s348_s12 = sshll.u32 %s137_s11, 3 }
   0xe   : > { %s139_s15 = scalar_lea.vmem %s516_s0, %s348_s12  ;;  %s143_s18 = scalar_lea.vmem %s517_s1, %s348_s12 }
  0x11   : > { %vm148_vm0 = vcmask 7168   ;;  %v433_v0 = vmov 0.0  }
  0x12   : > { %149 = vst.msk [vmem:[#allocation2] sm:$0xff] %vm148_vm0, %v433_v0 }
  0x13 PF: > { %v150_v1 = vld [vmem:[%s139_s15] sm:$0xff]  ;;  %vm158_vm1 = vcmask 130048   ;;  %v434_v4 = vmov 0.0   ;;  %v256_v59 = vlaneseq  ;;  %s355_s19 = sshll.u32 %s457_s10, 3  ;;  %p357_p5 = scmp.ne.s32.totalorder %s457_s10, 2 }
  0x14   : > { %v151_v2 = vld [vmem:[%s143_s18] sm:$0xff]  ;;  %v167_v3 = vsel %vm158_vm1, %v150_v1, -inf }
  0x15   : > { %vm152_vm2 = vcmp.eq.f32.partialorder %v151_v2, 0.0  ;;  %168 = vmax.xlane.f32.xlu0 %v167_v3  ;;  %v156_v8 = vsub.f32 %v150_v1, %v151_v2 }
  0x16   : > { %v351_v5 = vsel %vm152_vm2, 1.0, %v434_v4  ;;  %vm268_vm2 = vcmask 7168  }
  0x17   : > { %v155_v6 = vsub.f32 1.0, %v351_v5  ;;  %v157_v9 = vmul.f32 %v156_v8, %v156_v8 }
  0x19   : > { %v163_v7 = vsel %vm158_vm1, %v155_v6, 0.0  ;;  %v159_v10 = vsel %vm158_vm1, %v157_v9, 0.0 }
  0x1a   : > { %160 = vadd.xlane.f32.xlu2 %v159_v10  ;;  %v259_v10 = vstv %s355_s19 }
  0x1d   : > { %164 = vadd.xlane.f32.xlu0 %v163_v7 }
  0x88   : > { %v169_v11 = vpop.xlane.xlu0 %168 }
  0x89   : > { %v170_v12 = vsub.f32 %v150_v1, %v169_v11  ;;  %v175_v13 = vsub.f32 %v169_v11, %v150_v1  ;;  %v354_v35 = vadd.f32 -1.0, %v169_v11  ;;  %v215_v40 = vsub.f32 0.0, %v169_v11 }
  0x8b   : > { %v171_v14 = vmul.f32 %v351_v5, %v170_v12  ;;  %v176_v15 = vmul.f32 %v175_v13, %v155_v6  ;;  %v197_v39 = vmul.f32 1.442695, %v354_v35  ;;  %v216_v44 = vmul.f32 1.442695, %v215_v40 }
  0x8d   : > { %v172_v16 = vmul.f32 1.442695, %v171_v14  ;;  %v177_v17 = vmul.f32 1.442695, %v176_v15 }
  0x8f   : > { %379 = vpow2.f32 %v172_v16 }
  0x90   : > { %381 = vpow2.f32 %v177_v17  ;;  %v165_v24 = vpop.xlane.xlu0 %164 }
  0x91   : > { %v166_v25 = vsub.f32 16.0, %v165_v24  ;;  %vm186_vm3 = vcmp.eq.f32.partialorder %v165_v24, 0.0 }
  0x92   : > { %v477_v26 = vsel %vm186_vm3, 1.0, %v434_v4 }
  0x93   : > { %vm189_vm4 = vcmp.eq.f32.partialorder %v166_v25, 0.0  ;;  %v194_v28 = vadd.f32 %v477_v26, %v165_v24  ;;  %v192_v11 = vsub.f32 1.0, %v477_v26 }
  0x94   : > { %v480_v27 = vsel %vm189_vm4, 1.0, %v434_v4 }
  0x95   : > { %v380_v18 = vpop.eup %379  ;;  %v195_v29 = vadd.f32 %v480_v27, %v166_v25  ;;  %vm224_vm7 = vweird.f32 %v194_v28  ;;  %v230_v53 = vand.u32 2147483648, %v194_v28  ;;  %v228_v56 = vand.u32 2147483647, %v194_v28 }
  0x96   : > { %v174_v19 = vmul.f32 %v380_v18, %v351_v5  ;;  %v382_v21 = vpop.eup %381 }
  0x97   : > { %v179_v22 = vmul.f32 %v382_v21, %v155_v6  ;;  %v235_v30 = vmul.f32 %v195_v29, %v194_v28  ;;  %383 = vrcp.f32 %v195_v29  ;;  %vm205_vm5 = vweird.f32 %v195_v29 }
  0x98   : > { %v180_v20 = vsel %vm158_vm1, %v174_v19, 0.0  ;;  %385 = vrcp.f32 %v194_v28  ;;  %v211_v48 = vand.u32 2147483648, %v195_v29  ;;  %v209_v50 = vand.u32 2147483647, %v195_v29 }
  0x99   : > { %181 = vadd.xlane.f32.xlu1 %v180_v20  ;;  %v183_v23 = vsel %vm158_vm1, %v179_v22, 0.0  ;;  %387 = vrcp.f32 %v235_v30  ;;  %vm241_vm9 = vweird.f32 %v235_v30  ;;  %v247_v54 = vand.u32 2147483648, %v235_v30  ;;  %v161_v20 = vpop.xlane.xlu2 %160 }
  0x9a   : > { %389 = vpow2.f32 %v197_v39  ;;  %v245_v58 = vand.u32 2147483647, %v235_v30  ;;  %v212_v61 = vor.u32 1.1754944e-38, %v211_v48  ;;  %vm210_vm14 = vcmp.eq.f32.partialorder %v209_v50, 8.507059e+37 }
  0x9b   : > { %391 = vpow2.f32 %v216_v44  ;;  %v231_v2 = vor.u32 1.1754944e-38, %v230_v53  ;;  %v248_v3 = vor.u32 1.1754944e-38, %v247_v54  ;;  %vm229_vm15 = vcmp.eq.f32.partialorder %v228_v56, 8.507059e+37 }
  0x9c   : > { %vm246_vm0 = vcmp.eq.f32.partialorder %v245_v58, 8.507059e+37  ;;  %v257_v6 = vshrl.u32 %v256_v59, 7  ;;  %v193_v22 = vsub.f32 %v192_v11, %v480_v27 }
  0x9d   : > { %v384_v31 = vpop.eup %383 }
  0x9e   : > { %v386_v32 = vpop.eup %385  ;;  %v201_v34 = vmul.f32 %v384_v31, %v195_v29  ;;  %vm206_vm6 = vweird.f32 %v384_v31  ;;  %v260_v19 = vadd.s32 %v259_v10, %v257_v6 }
  0x9f   : > { %v388_v33 = vpop.eup %387  ;;  %v220_v36 = vmul.f32 %v386_v32, %v194_v28  ;;  %vm225_vm8 = vweird.f32 %v386_v32  ;;  %vm484_vm11 = vmor %vm205_vm5, %vm206_vm6  ;;  %v162_v28 = vmul.f32 0.003125, %v161_v20 }
  0xa0   : > { %v237_v37 = vmul.f32 %v388_v33, %v235_v30  ;;  %v202_v38 = vsub.f32 1.0, %v201_v34  ;;  %vm242_vm10 = vweird.f32 %v388_v33  ;;  %vm488_vm12 = vmor %vm224_vm7, %vm225_vm8  ;;  %v390_v60 = vpop.eup %389  ;;  %vm261_vm1 = vcmp.lt.s32.totalorder %v260_v19, 20 }
  0xa1   : > { %184 = vadd.xlane.f32.xlu1 %v183_v23  ;;  %v221_v41 = vsub.f32 1.0, %v220_v36  ;;  %vm492_vm13 = vmor %vm241_vm9, %vm242_vm10  ;;  %v392_v7 = vpop.eup %391  ;;  %v356_v30 = vsel %vm261_vm1, 1.0, %v434_v4 }
  0xa2   : > { %v238_v42 = vsub.f32 1.0, %v237_v37  ;;  %v203_v43 = vmul.f32 %v384_v31, %v202_v38 }
  0xa3   : > { %v222_v45 = vmul.f32 %v386_v32, %v221_v41 }
  0xa4   : > { %v239_v46 = vmul.f32 %v388_v33, %v238_v42  ;;  %v204_v49 = vadd.f32 %v384_v31, %v203_v43 }
  0xa5   : > { %v223_v52 = vadd.f32 %v386_v32, %v222_v45 }
  0xa6   : > { %v240_v57 = vadd.f32 %v388_v33, %v239_v46  ;;  %v208_v0 = vsel %vm484_vm11, %v384_v31, %v204_v49 }
  0xa7   : > { %v227_v1 = vsel %vm488_vm12, %v386_v32, %v223_v52  ;;  %v213_v8 = vsel %vm210_vm14, %v212_v61, %v208_v0  ;;  %v264_v32 = vld [vmem:[#allocation2] sm:$0xff] }
  0xa8   : > { %v244_v5 = vsel %vm492_vm13, %v388_v33, %v240_v57  ;;  %v232_v15 = vsel %vm229_vm15, %v231_v2, %v227_v1 }
  0xa9   : > { %v249_v16 = vsel %vm246_vm0, %v248_v3, %v244_v5 }
 0x10c   : > { %v182_v47 = vpop.xlane.xlu1 %181 }
 0x10d   : > { %v199_v63 = vmul.f32 %v390_v60, %v182_v47 }
 0x10f   : > { %v214_v12 = vmul.f32 %v213_v8, %v199_v63 }
 0x111   : > { %v251_v21 = vmul.f32 %v477_v26, %v214_v12 }
 0x114   : > { %v185_v9 = vpop.xlane.xlu1 %184 }
 0x115   : > { %v218_v13 = vmul.f32 %v392_v7, %v185_v9  ;;  %v234_v14 = vmul.f32 %v185_v9, %v182_v47 }
 0x117   : > { %v233_v17 = vmul.f32 %v232_v15, %v218_v13  ;;  %v250_v18 = vmul.f32 %v249_v16, %v234_v14 }
 0x119   : > { %v252_v23 = vmul.f32 %v480_v27, %v233_v17  ;;  %v254_v24 = vmul.f32 %v250_v18, %v193_v22 }
 0x11b   : > { %v253_v25 = vadd.f32 %v252_v23, %v251_v21 }
 0x11d   : > { %v255_v29 = vadd.f32 %v254_v24, %v253_v25 }
 0x11f   : > { %v265_v31 = vadd.f32 %v255_v29, %v162_v28 }
 0x121   : > { %v266_v33 = vmul.f32 %v356_v30, %v265_v31  ;;  %273 = sbr.rel (%p357_p5) target bundleno = 315 (0x13b), region = 36 }
 0x123   : > { %v267_v34 = vadd.f32 %v266_v33, %v264_v32 }
 0x125   : > { %269 = vst.msk [vmem:[#allocation2] sm:$0xff] %vm268_vm2, %v267_v34 }
 0x126   : > { %vm282_vm3 = vcmask 0  }
 0x12c   : > { %v274_v26 = vld [vmem:[#allocation2] sm:$0xff] }
 0x12d   : > { %v275_v35 = vsel %vm268_vm2, %v274_v26, 0.0 }
 0x12e   : > { %v276_v36 = vrot.slane %v275_v35, 4 }
 0x130   : > { %v277_v27 = vadd.f32 %v276_v36, %v275_v35 }
 0x132   : > { %v278_v37 = vrot.slane %v277_v27, 2 }
 0x134   : > { %v279_v38 = vadd.f32 %v278_v37, %v277_v27 }
 0x136   : > { %v280_v39 = vrot.slane %v279_v38, 1 }
 0x138   : > { %v281_v40 = vadd.f32 %v280_v39, %v279_v38 }
 0x13a   : > { %283 = vst.msk [vmem:[#allocation3] sm:$0x1] %vm282_vm3, %v281_v40 }
 0x13b PF: > { %p366_p6 = scmp.eq.s32.totalorder %s457_s10, 2  ;;  %s435_s20 = smov [#allocation3]  }
 0x13c   : > { %s290_s21 = sshll.u32 %s435_s20, 4  ;;  %s292_s24 = sshll.u32 %s518_s2, 4  ;;  %s291_s21 = int_to_ptr.vmem [resolvable:$true] %s290_s21  ;;  %s293_s24 = int_to_ptr.hbm [resolvable:$true] %s292_s24 }
 0x13d   : > { %363 = dma.vmem_to_hbm [thread:$0]  (%p366_p6), %s291_s21, 16, %s293_s24, [#allocation4]  }
 0x13e   : > { %426 = dma.done.wait (%p366_p6), [#allocation4], 16  }
 0x13f   : > { %428 = vsyncadd (%p366_p6), [#allocation4], 4294967280 }
 0x140 PF: > { %s13_s9 = sadd.s32 1, %s431_s9  }
 0x141   : > { %p10_p7 = scmp.ge.s32.totalorder %s13_s9, 5  }
 0x143   :  { %12 = sbr.rel (!%p10_p7) target bundleno = 1 (0x1), region = 66 }
 0x148   :  { %306 = vsyncpa [#allocation4], 1 }
 0x149   :  { %308 = vsyncpa [#allocation4 + $0x1], 1 }

</bundles_post_ra>
